<compile_context>
chip_gen: v5e
topology: v5e:2x2
jax: 0.10.0
libtpu: 0.0.40
codegen_flags: <defaults>
</compile_context>

<pallas_src>
import functools

import jax
import jax.numpy as jnp
from jax.experimental import pallas as pl
from jax.experimental.pallas import tpu as pltpu


def _round_up(x, m):
    return ((x + m - 1) // m) * m


def _pip_heads_kernel(x_ref, w_ref, b_ref, o_ref):
    """Fused five-head 1x1 conv tile: out = x @ W + b.

    x_ref : (TM, Cin)   bf16 backbone feature rows
    w_ref : (Cin, TN)   bf16 fused [cls|x|y|nb_x|nb_y] weight tile
    b_ref : (1, TN)     f32 fused bias tile (zero in the pad region)
    o_ref : (TM, TN)    bf16 output tile (f32 MXU accumulation, bf16 store)
    """
    acc = jnp.dot(x_ref[...], w_ref[...], preferred_element_type=jnp.float32)
    o_ref[...] = (acc + b_ref[...]).astype(o_ref.dtype)


def _pick_tm(m, cap=512, target_steps=8):
    """16-aligned row-tile giving ~target_steps grid steps.

    Prefers a tile that divides m exactly so the jnp.pad copy is skipped.
    """
    tm = min(cap, max(16, _round_up(pl.cdiv(m, target_steps), 16)))
    if m % tm != 0:
        for cand in range(tm, 15, -16):
            if m % cand == 0:
                return cand
    return tm


@functools.partial(jax.jit, static_argnames=("num_lms", "num_nb"))
def pip_resnet50_heads(feat_nhwc, wh, bh, *, num_lms, num_nb):
    """Five fused 1x1-conv heads of Pip_resnet50 (cls / x / y / nb_x / nb_y).

    feat_nhwc : (B, H, W, 2048) ResNet-50 layer4 features, channels-last.
                (JAX backbones naturally emit NHWC; for an NCHW producer do
                 jnp.transpose(feat, (0, 2, 3, 1)) once before calling.)
    wh        : (2048, Cout_pad) bf16 fused head weights, Cout zero-padded to
                a multiple of 128 (lane-dense stores).
    bh        : (1, Cout_pad)    f32 fused head biases (zero in pad region).

    Returns the five head outputs in NCHW (bf16), matching the PyTorch module.
    """
    B, H, W, Cin = feat_nhwc.shape
    Cout_pad = wh.shape[1]
    M = B * H * W

    # Channels-last -> rows is a free reshape (no transpose HLO, no extra HBM
    # round trip); bf16 operands halve input DMA bytes.
    x_rows = feat_nhwc.astype(jnp.bfloat16).reshape(M, Cin)

    # --- tiling -------------------------------------------------------------
    TM = _pick_tm(M)                       # 16-aligned rows, >= ~8 grid steps
    M_pad = _round_up(M, TM)
    if M_pad != M:
        x_rows = jnp.pad(x_rows, ((0, M_pad - M), (0, 0)))

    # Output-channel tiles: stream weights in <=256-wide tiles (parallel axis).
    TN = 256 if (Cout_pad % 256 == 0 and Cout_pad > 128) else 128
    n_tiles = Cout_pad // TN
    m_tiles = M_pad // TM

    out_dtype = jnp.bfloat16               # bf16 writeback: half the HBM bytes

    # Explicit VMEM budget: double-buffered x / weight / bias / out tiles,
    # generous 2x + 8 MiB margin, capped at v7x's 64 MiB physical VMEM.
    vmem_bytes = (2 * TM * Cin * 2          # x tiles (bf16)
                  + 2 * Cin * TN * 2        # weight tiles (bf16)
                  + 2 * TN * 4              # bias tiles (f32)
                  + 2 * TM * TN * 2)        # out tiles (bf16)
    vmem_limit = min(2 * vmem_bytes + (8 << 20), 64 << 20)

    out_rows = pl.pallas_call(
        _pip_heads_kernel,
        out_shape=jax.ShapeDtypeStruct((M_pad, Cout_pad), out_dtype),
        # n outer / m inner: each weight tile is DMA'd once and stays resident
        # while the row tiles stream past it.
        grid=(n_tiles, m_tiles),
        in_specs=[
            pl.BlockSpec((TM, Cin), lambda n, m: (m, 0)),   # x rows, streamed
            pl.BlockSpec((Cin, TN), lambda n, m: (0, n)),   # weight tile
            pl.BlockSpec((1, TN), lambda n, m: (0, n)),     # bias tile
        ],
        out_specs=pl.BlockSpec((TM, TN), lambda n, m: (m, n)),
        compiler_params=pltpu.CompilerParams(
            dimension_semantics=("parallel", "parallel"),
            vmem_limit_bytes=vmem_limit,
        ),
    )(x_rows, wh, bh)

    out_rows = out_rows[:M]

    # One layout pass on the (small) head output: rows -> NHWC -> NCHW, then
    # the five heads are cheap major-axis channel slices (no lane relayouts,
    # no per-head transposes).
    out_nchw = jnp.transpose(out_rows.reshape(B, H, W, Cout_pad), (0, 3, 1, 2))

    sizes = (num_lms, num_lms, num_lms, num_nb * num_lms, num_nb * num_lms)
    outs, off = [], 0
    for c in sizes:
        outs.append(out_nchw[:, off:off + c])
        off += c
    return tuple(outs)


def init_params(key, num_lms, num_nb, cin=2048):
    """Deterministic synthetic parameters matching the module's __init__.

    Heads: Conv2d(2048, cout, 1) with nn.init.normal_(std=0.001), bias = 0.
    Returns fused (bf16 weights, f32 bias) with Cout padded to a multiple of
    128 for lane-dense stores, plus the f32 fused weights for the reference.
    """
    k1, k2, k3, k4, k5 = jax.random.split(key, 5)

    def head(k, cout):
        return jax.random.normal(k, (cout, cin), jnp.float32) * 0.001

    w_cls = head(k1, num_lms)
    w_x = head(k2, num_lms)
    w_y = head(k3, num_lms)
    w_nbx = head(k4, num_nb * num_lms)
    w_nby = head(k5, num_nb * num_lms)

    wh = jnp.concatenate([w_cls, w_x, w_y, w_nbx, w_nby], axis=0).T  # (Cin, Cout)
    cout = wh.shape[1]
    cout_pad = _round_up(cout, 128)
    if cout_pad != cout:
        wh = jnp.pad(wh, ((0, 0), (0, cout_pad - cout)))
    bh = jnp.zeros((1, cout_pad), jnp.float32)
    return wh.astype(jnp.bfloat16), bh, wh.astype(jnp.float32)


if __name__ == "__main__":
    # Small, consistent shapes: num_lms=8, num_nb=4; heads consume the resnet
    # layer4 feature map (2048 channels; input 256, stride 32 -> 8x8), batch=2.
    num_lms, num_nb = 8, 4
    B, Cin, H, W = 2, 2048, 8, 8

    key = jax.random.PRNGKey(0)
    k_x, k_p = jax.random.split(key)
    # Backbone feature map in channels-last layout (natural JAX conv output).
    feat = jax.random.normal(k_x, (B, H, W, Cin), jnp.float32)

    wh_bf16, bh, wh_f32 = init_params(k_p, num_lms, num_nb, cin=Cin)

    outs = pip_resnet50_heads(feat, wh_bf16, bh, num_lms=num_lms, num_nb=num_nb)
    outs = jax.block_until_ready(outs)

    x1, x2, x3, x4, x5 = outs
    assert x1.shape == (B, num_lms, H, W)
    assert x2.shape == (B, num_lms, H, W)
    assert x3.shape == (B, num_lms, H, W)
    assert x4.shape == (B, num_nb * num_lms, H, W)
    assert x5.shape == (B, num_nb * num_lms, H, W)

    # Pure-JAX f32 reference (bf16 operands + bf16 output -> relaxed tolerance).
    rows = feat.reshape(B * H * W, Cin)
    ref_rows = rows @ wh_f32 + bh
    ref = jnp.transpose(ref_rows.reshape(B, H, W, -1), (0, 3, 1, 2))
    got = jnp.concatenate([o.astype(jnp.float32) for o in (x1, x2, x3, x4, x5)],
                          axis=1)
    cout = 3 * num_lms + 2 * num_nb * num_lms
    assert jnp.allclose(got, ref[:, :cout], rtol=5e-2, atol=3e-3), (
        float(jnp.max(jnp.abs(got - ref[:, :cout])))
    )

    print("KERNEL_OK")
</pallas_src>

<mosaic_0001>
module attributes {stable_mosaic.version = 11 : i64} {
  func.func @_pip_heads_kernel(%arg0: i32, %arg1: i32, %arg2: memref<16x2048xbf16, #tpu.memory_space<vmem>>, %arg3: memref<2048x128xbf16, #tpu.memory_space<vmem>>, %arg4: memref<1x128xf32, #tpu.memory_space<vmem>>, %arg5: memref<16x128xbf16, #tpu.memory_space<vmem>>) attributes {dimension_semantics = [#tpu.dimension_semantics<parallel>, #tpu.dimension_semantics<parallel>], iteration_bounds = array<i64: 1, 8>, scalar_prefetch = 0 : i64, scratch_operands = 0 : i64, tpu.core_type = #tpu.core_type<tc>, window_params = [{transform_indices = @transform_0, window_bounds = array<i64: 16, 2048>}, {transform_indices = @transform_1, window_bounds = array<i64: 2048, 128>}, {transform_indices = @transform_2, window_bounds = array<i64: 1, 128>}, {transform_indices = @transform_3, window_bounds = array<i64: 16, 128>}]} {
    %c0 = arith.constant 0 : index
    %c0_0 = arith.constant 0 : index
    %0 = vector.load %arg2[%c0, %c0_0] : memref<16x2048xbf16, #tpu.memory_space<vmem>>, vector<16x2048xbf16>
    %c0_1 = arith.constant 0 : index
    %c0_2 = arith.constant 0 : index
    %1 = vector.load %arg3[%c0_1, %c0_2] : memref<2048x128xbf16, #tpu.memory_space<vmem>>, vector<2048x128xbf16>
    %cst = arith.constant dense<0.000000e+00> : vector<16x128xf32>
    %2 = tpu.matmul %0, %1, %cst {dimension_numbers = #tpu.dot_dimension_numbers<[1], [0], [0], [1], [0, 0, 1, 1], [], []>} : vector<16x2048xbf16>, vector<2048x128xbf16>, vector<16x128xf32> -> vector<16x128xf32>
    %c0_3 = arith.constant 0 : index
    %c0_4 = arith.constant 0 : index
    %3 = vector.load %arg4[%c0_3, %c0_4] : memref<1x128xf32, #tpu.memory_space<vmem>>, vector<1x128xf32>
    %4 = vector.broadcast %3 : vector<1x128xf32> to vector<16x128xf32>
    %5 = arith.addf %2, %4 : vector<16x128xf32>
    %6 = arith.truncf %5 : vector<16x128xf32> to vector<16x128xbf16>
    %c0_5 = arith.constant 0 : index
    %c0_6 = arith.constant 0 : index
    %7 = vector.load %arg5[%c0_5, %c0_6] : memref<16x128xbf16, #tpu.memory_space<vmem>>, vector<16x128xbf16>
    tpu.vector_store %arg5[%c0_5, %c0_6], %6 {strides = array<i32>} : memref<16x128xbf16, #tpu.memory_space<vmem>>, vector<16x128xbf16>,
    return
  }
  func.func @transform_0(%arg0: i32, %arg1: i32) -> (i32, i32) {
    %c0_i32 = arith.constant 0 : i32
    %c0_i32_0 = arith.constant 0 : i32
    return %arg1, %c0_i32 : i32, i32
  }
  func.func @transform_1(%arg0: i32, %arg1: i32) -> (i32, i32) {
    %c0_i32 = arith.constant 0 : i32
    %c0_i32_0 = arith.constant 0 : i32
    return %c0_i32, %arg0 : i32, i32
  }
  func.func @transform_2(%arg0: i32, %arg1: i32) -> (i32, i32) {
    %c0_i32 = arith.constant 0 : i32
    %c0_i32_0 = arith.constant 0 : i32
    return %c0_i32, %arg0 : i32, i32
  }
  func.func @transform_3(%arg0: i32, %arg1: i32) -> (i32, i32) {
    %c0_i32 = arith.constant 0 : i32
    return %arg1, %arg0 : i32, i32
  }
}

</mosaic_0001>

<bundles_post_ra>
// kernel: pip_resnet50_heads.1
= control target key start
LH: loop header
LB: loop body
LE: loop exit
PB: predicated region body
PF: predicated region fallthrough
CT: control target
= control target key end

     0   :  { %s2491_s12 = smov 0   ;;  %s2493_s13 = smov 0   ;;  %s2952_s0 = inlined_call_operand.vmem [shape: bf16[128,2048], index: 0, kind: input, shape index: {}]   ;;  %s2953_s1 = inlined_call_operand.vmem [shape: bf16[2048,128], index: 1, kind: input, shape index: {}]   ;;  %s2954_s2 = inlined_call_operand.vmem [shape: f32[1,128], index: 2, kind: input, shape index: {}]   ;;  %s2955_s3 = inlined_call_operand.vmem [shape: bf16[128,128], index: 3, kind: output, shape index: {}]  }
   0x1   :  { %s2495_s14 = smov 0  }
   0x2 LB: > { %s22_s15 = sadd.s32 1, %s2465_s13  ;;  %p1688_p0 = scmp.ge.s32.totalorder %s2469_s14, 1  ;;  %s2469_s14 = sphi %s2495_s14, %s13_s14   ;;  %s2465_s13 = sphi %s2493_s13, %s2957_s13   ;;  %s2461_s12 = sphi %s2491_s12, %s2956_s12  }
   0x3   : > { %p23_p1 = scmp.ge.s32.totalorder %s22_s15, 8  ;;  %p170_p2 = scmp.lt.s32.totalorder %s2469_s14, 9 }
   0x5   : > { %s2959_s15 = smov (%p23_p1, %s22_s15), 0  ;;  %p171_p3 = pnand %p1688_p0, %p170_p2 }
   0x6   : > { %s1689_s17 = sshll.u32 (!%p171_p3), %s2461_s12, 1 }
   0x7   : > { %174 = sbr.rel (%p171_p3) target bundleno = 289 (0x121), region = 32  ;;  %p206_p4 = scmp.lt.s32.totalorder (!%p171_p3), %s1689_s17, 15 }
   0xc   : > { %v2296_v0 = vld [vmem:[%s2953_s1 + $0x38] sm:$0xff]  ;;  %v2295_v4 = vld [vmem:[%s2953_s1 + $0x30] sm:$0xff]  ;;  %v2294_v8 = vld [vmem:[%s2953_s1 + $0x28] sm:$0xff]  ;;  %s2961_s17 = smov (!%p206_p4, %s1689_s17), 15 }
   0xd   : > { %v2304_v1 = vld [vmem:[%s2953_s1 + $0x78] sm:$0xff]  ;;  %1352 = vmatpush.bf16.msra.mxu0 %v2296_v0  ;;  %v2303_v5 = vld [vmem:[%s2953_s1 + $0x70] sm:$0xff]  ;;  %v2302_v9 = vld [vmem:[%s2953_s1 + $0x68] sm:$0xff]  ;;  %s2272_s19 = sshll.u32 %s2961_s17, 6  ;;  %s1693_s6 = sshll.u32 %s2961_s17, 2 }
   0xe   : > { %v2312_v2 = vld [vmem:[%s2953_s1 + $0xb8] sm:$0xff]  ;;  %1366 = vmatpush.bf16.msra.mxu1 %v2304_v1  ;;  %v2311_v6 = vld [vmem:[%s2953_s1 + $0xb0] sm:$0xff]  ;;  %v2310_v10 = vld [vmem:[%s2953_s1 + $0xa8] sm:$0xff]  ;;  %s2602_s29 = scalar_lea.vmem %s2952_s0, %s2272_s19  ;;  %s226_s9 = scalar_lea.vmem %s2955_s3, %s1693_s6 }
   0xf   : > { %v2320_v3 = vld [vmem:[%s2953_s1 + $0xf8] sm:$0xff]  ;;  %1380 = vmatpush.bf16.msra.mxu2 %v2312_v2  ;;  %v2319_v7 = vld [vmem:[%s2953_s1 + $0xf0] sm:$0xff]  ;;  %v2318_v11 = vld [vmem:[%s2953_s1 + $0xe8] sm:$0xff] }
  0x10   : > { %1394 = vmatpush.bf16.msra.mxu3 %v2320_v3  ;;  %v2293_v12 = vld [vmem:[%s2953_s1 + $0x20] sm:$0xff]  ;;  %v2292_v16 = vld [vmem:[%s2953_s1 + $0x18] sm:$0xff]  ;;  %v2291_v20 = vld [vmem:[%s2953_s1 + $0x10] sm:$0xff] }
  0x11   : > { %1353 = vmatpush.bf16.msra.mxu0 %v2295_v4  ;;  %v2301_v13 = vld [vmem:[%s2953_s1 + $0x60] sm:$0xff]  ;;  %v2300_v17 = vld [vmem:[%s2953_s1 + $0x58] sm:$0xff]  ;;  %v2299_v21 = vld [vmem:[%s2953_s1 + $0x50] sm:$0xff] }
  0x12   : > { %1367 = vmatpush.bf16.msra.mxu1 %v2303_v5  ;;  %v2309_v14 = vld [vmem:[%s2953_s1 + $0xa0] sm:$0xff]  ;;  %v2308_v18 = vld [vmem:[%s2953_s1 + $0x98] sm:$0xff]  ;;  %v2307_v22 = vld [vmem:[%s2953_s1 + $0x90] sm:$0xff] }
  0x13   : > { %1381 = vmatpush.bf16.msra.mxu2 %v2311_v6  ;;  %v2317_v15 = vld [vmem:[%s2953_s1 + $0xe0] sm:$0xff]  ;;  %v2316_v19 = vld [vmem:[%s2953_s1 + $0xd8] sm:$0xff]  ;;  %v2315_v23 = vld [vmem:[%s2953_s1 + $0xd0] sm:$0xff] }
  0x14   : > { %1395 = vmatpush.bf16.msra.mxu3 %v2319_v7  ;;  %v2290_v24 = vld [vmem:[%s2953_s1 + $0x8] sm:$0xff]  ;;  %v2289_v28 = vld [vmem:[%s2953_s1] sm:$0xff]  ;;  %v2328_v32 = vld [vmem:[%s2953_s1 + $0x138] sm:$0xff] }
  0x15   : > { %1354 = vmatpush.bf16.msra.mxu0 %v2294_v8  ;;  %v2298_v25 = vld [vmem:[%s2953_s1 + $0x48] sm:$0xff]  ;;  %v2297_v29 = vld [vmem:[%s2953_s1 + $0x40] sm:$0xff]  ;;  %v2336_v33 = vld [vmem:[%s2953_s1 + $0x178] sm:$0xff] }
  0x16   : > { %1368 = vmatpush.bf16.msra.mxu1 %v2302_v9  ;;  %v2306_v26 = vld [vmem:[%s2953_s1 + $0x88] sm:$0xff]  ;;  %v2305_v30 = vld [vmem:[%s2953_s1 + $0x80] sm:$0xff]  ;;  %v2344_v42 = vld [vmem:[%s2953_s1 + $0x1b8] sm:$0xff] }
  0x17   : > { %1382 = vmatpush.bf16.msra.mxu2 %v2310_v10  ;;  %v2314_v27 = vld [vmem:[%s2953_s1 + $0xc8] sm:$0xff]  ;;  %v2313_v31 = vld [vmem:[%s2953_s1 + $0xc0] sm:$0xff]  ;;  %v2352_v43 = vld [vmem:[%s2953_s1 + $0x1f8] sm:$0xff] }
  0x18   : > { %1396 = vmatpush.bf16.msra.mxu3 %v2318_v11  ;;  %v1696_v34 = vld [vmem:[%s2602_s29] sm:$0xf]  ;;  %v1704_v36 = vld [vmem:[%s2602_s29 + $0x8] sm:$0xf]  ;;  %v2273_v38 = vld [vmem:[%s2602_s29 + $0x4] sm:$0xf] }
  0x19   : > { %1355 = vmatpush.bf16.msra.mxu0 %v2293_v12  ;;  %v2281_v35 = vld [vmem:[%s2602_s29 + $0x3c] sm:$0xf0]  ;;  %v2282_v37 = vld [vmem:[%s2602_s29 + $0x44] sm:$0xf0]  ;;  %v1698_v39 = vld [vmem:[%s2602_s29 + $0x40] sm:$0xf0] }
  0x1a   : > { %1369 = vmatpush.bf16.msra.mxu1 %v2301_v13  ;;  %v2274_v40 = vld [vmem:[%s2602_s29 + $0xc] sm:$0xf]  ;;  %v1697_v44 = vor.u32 %v2281_v35, %v1696_v34  ;;  %v1705_v45 = vor.u32 %v2282_v37, %v1704_v36  ;;  %v1701_v46 = vor.u32 %v2273_v38, %v1698_v39  ;;  %v2327_v48 = vld [vmem:[%s2953_s1 + $0x130] sm:$0xff]  ;;  %v2325_v56 = vld [vmem:[%s2953_s1 + $0x120] sm:$0xff] }
  0x1b   : > { %1383 = vmatpush.bf16.msra.mxu2 %v2309_v14  ;;  %v1706_v41 = vld [vmem:[%s2602_s29 + $0x48] sm:$0xf0]  ;;  %v2335_v49 = vld [vmem:[%s2953_s1 + $0x170] sm:$0xff]  ;;  %v2333_v57 = vld [vmem:[%s2953_s1 + $0x160] sm:$0xff] }
  0x1c   : > { %1397 = vmatpush.bf16.msra.mxu3 %v2317_v15  ;;  %v1709_v47 = vor.u32 %v2274_v40, %v1706_v41  ;;  %v2343_v50 = vld [vmem:[%s2953_s1 + $0x1b0] sm:$0xff]  ;;  %v2326_v52 = vld [vmem:[%s2953_s1 + $0x128] sm:$0xff]  ;;  %v2341_v58 = vld [vmem:[%s2953_s1 + $0x1a0] sm:$0xff] }
  0x1d   : > { %1356 = vmatpush.bf16.msra.mxu0 %v2292_v16  ;;  %v2351_v51 = vld [vmem:[%s2953_s1 + $0x1f0] sm:$0xff]  ;;  %v2334_v53 = vld [vmem:[%s2953_s1 + $0x168] sm:$0xff]  ;;  %v2349_v59 = vld [vmem:[%s2953_s1 + $0x1e0] sm:$0xff] }
  0x1e   : > { %1370 = vmatpush.bf16.msra.mxu1 %v2300_v17  ;;  %v2342_v54 = vld [vmem:[%s2953_s1 + $0x1a8] sm:$0xff]  ;;  %v2324_v60 = vld [vmem:[%s2953_s1 + $0x118] sm:$0xff]  ;;  %v2323_v0 = vld [vmem:[%s2953_s1 + $0x110] sm:$0xff] }
  0x1f   : > { %1384 = vmatpush.bf16.msra.mxu2 %v2308_v18  ;;  %v2350_v55 = vld [vmem:[%s2953_s1 + $0x1e8] sm:$0xff]  ;;  %v2332_v61 = vld [vmem:[%s2953_s1 + $0x158] sm:$0xff]  ;;  %v2331_v1 = vld [vmem:[%s2953_s1 + $0x150] sm:$0xff] }
  0x20   : > { %1398 = vmatpush.bf16.msra.mxu3 %v2316_v19  ;;  %v2340_v62 = vld [vmem:[%s2953_s1 + $0x198] sm:$0xff]  ;;  %v2339_v2 = vld [vmem:[%s2953_s1 + $0x190] sm:$0xff]  ;;  %v2322_v4 = vld [vmem:[%s2953_s1 + $0x108] sm:$0xff] }
  0x21   : > { %1357 = vmatpush.bf16.msra.mxu0 %v2291_v20  ;;  %v2348_v63 = vld [vmem:[%s2953_s1 + $0x1d8] sm:$0xff]  ;;  %v2347_v3 = vld [vmem:[%s2953_s1 + $0x1d0] sm:$0xff]  ;;  %v2330_v5 = vld [vmem:[%s2953_s1 + $0x148] sm:$0xff] }
  0x22   : > { %1371 = vmatpush.bf16.msra.mxu1 %v2299_v21  ;;  %v2338_v6 = vld [vmem:[%s2953_s1 + $0x188] sm:$0xff]  ;;  %v2321_v8 = vld [vmem:[%s2953_s1 + $0x100] sm:$0xff]  ;;  %v2360_v12 = vld [vmem:[%s2953_s1 + $0x238] sm:$0xff] }
  0x23   : > { %1385 = vmatpush.bf16.msra.mxu2 %v2307_v22  ;;  %v2346_v7 = vld [vmem:[%s2953_s1 + $0x1c8] sm:$0xff]  ;;  %v2329_v9 = vld [vmem:[%s2953_s1 + $0x140] sm:$0xff]  ;;  %v2368_v13 = vld [vmem:[%s2953_s1 + $0x278] sm:$0xff] }
  0x24   : > { %1399 = vmatpush.bf16.msra.mxu3 %v2315_v23  ;;  %v2337_v10 = vld [vmem:[%s2953_s1 + $0x180] sm:$0xff]  ;;  %v1712_v14 = vld [vmem:[%s2602_s29 + $0x10] sm:$0xf]  ;;  %v1720_v16 = vld [vmem:[%s2602_s29 + $0x18] sm:$0xf] }
  0x25   : > { %1358 = vmatpush.bf16.msra.mxu0 %v2290_v24  ;;  %v2345_v11 = vld [vmem:[%s2953_s1 + $0x1c0] sm:$0xff]  ;;  %v2283_v15 = vld [vmem:[%s2602_s29 + $0x4c] sm:$0xf0]  ;;  %v2284_v17 = vld [vmem:[%s2602_s29 + $0x54] sm:$0xf0] }
  0x26   : > { %1372 = vmatpush.bf16.msra.mxu1 %v2298_v25  ;;  %v2275_v18 = vld [vmem:[%s2602_s29 + $0x14] sm:$0xf]  ;;  %v2276_v20 = vld [vmem:[%s2602_s29 + $0x1c] sm:$0xf]  ;;  %v1713_v24 = vor.u32 %v2283_v15, %v1712_v14  ;;  %v1721_v25 = vor.u32 %v2284_v17, %v1720_v16  ;;  %v2374_v34 = vld [vmem:[%s2953_s1 + $0x2a8] sm:$0xff] }
  0x27   : > { %1386 = vmatpush.bf16.msra.mxu2 %v2306_v26  ;;  %v1714_v19 = vld [vmem:[%s2602_s29 + $0x50] sm:$0xf0]  ;;  %v1722_v21 = vld [vmem:[%s2602_s29 + $0x58] sm:$0xf0]  ;;  %v2382_v35 = vld [vmem:[%s2953_s1 + $0x2e8] sm:$0xff] }
  0x28   : > { %1400 = vmatpush.bf16.msra.mxu3 %v2314_v27  ;;  %v2376_v22 = vld [vmem:[%s2953_s1 + $0x2b8] sm:$0xff]  ;;  %v1717_v26 = vor.u32 %v2275_v18, %v1714_v19  ;;  %v1725_v27 = vor.u32 %v2276_v20, %v1722_v21  ;;  %v2357_v36 = vld [vmem:[%s2953_s1 + $0x220] sm:$0xff]  ;;  %v2406_v14 = vld [vmem:[%s2953_s1 + $0x3a8] sm:$0xff] }
  0x29   : > { %1359 = vmatpush.bf16.msra.mxu0 %v2289_v28  ;;  %v2384_v23 = vld [vmem:[%s2953_s1 + $0x2f8] sm:$0xff]  ;;  %v2359_v28 = vld [vmem:[%s2953_s1 + $0x230] sm:$0xff]  ;;  %v2365_v37 = vld [vmem:[%s2953_s1 + $0x260] sm:$0xff] }
  0x2a   : > { %1373 = vmatpush.bf16.msra.mxu1 %v2297_v29  ;;  %v2367_v29 = vld [vmem:[%s2953_s1 + $0x270] sm:$0xff]  ;;  %v2373_v38 = vld [vmem:[%s2953_s1 + $0x2a0] sm:$0xff]  ;;  %v2356_v40 = vld [vmem:[%s2953_s1 + $0x218] sm:$0xff] }
  0x2b   : > { %1387 = vmatpush.bf16.msra.mxu2 %v2305_v30  ;;  %v2375_v30 = vld [vmem:[%s2953_s1 + $0x2b0] sm:$0xff]  ;;  %v2381_v39 = vld [vmem:[%s2953_s1 + $0x2e0] sm:$0xff]  ;;  %v2364_v41 = vld [vmem:[%s2953_s1 + $0x258] sm:$0xff] }
  0x2c   : > { %1401 = vmatpush.bf16.msra.mxu3 %v2313_v31  ;;  %1360 = vmatmul.bf16.vlgmr.msra.gmra.mxu0 %v1697_v44  ;;  %v2383_v31 = vld [vmem:[%s2953_s1 + $0x2f0] sm:$0xff]  ;;  %v2414_v15 = vld [vmem:[%s2953_s1 + $0x3e8] sm:$0xff]  ;;  %v2389_v16 = vld [vmem:[%s2953_s1 + $0x320] sm:$0xff] }
  0x2d   : > { %1408 = vmatpush.bf16.msrb.mxu0 %v2328_v32  ;;  %1374 = vmatmul.bf16.vlgmr.msra.gmra.mxu1 %v1701_v46  ;;  %v2358_v32 = vld [vmem:[%s2953_s1 + $0x228] sm:$0xff]  ;;  %v2355_v44 = vld [vmem:[%s2953_s1 + $0x210] sm:$0xff]  ;;  %v2397_v17 = vld [vmem:[%s2953_s1 + $0x360] sm:$0xff] }
  0x2e   : > { %1422 = vmatpush.bf16.msrb.mxu1 %v2336_v33  ;;  %1388 = vmatmul.bf16.vlgmr.msra.gmra.mxu2 %v1705_v45  ;;  %v2366_v33 = vld [vmem:[%s2953_s1 + $0x268] sm:$0xff]  ;;  %v2363_v45 = vld [vmem:[%s2953_s1 + $0x250] sm:$0xff]  ;;  %v2405_v18 = vld [vmem:[%s2953_s1 + $0x3a0] sm:$0xff] }
  0x2f   : > { %1436 = vmatpush.bf16.msrb.mxu2 %v2344_v42  ;;  %1402 = vmatmul.bf16.vlgmr.msra.gmra.mxu3 %v1709_v47  ;;  %v2372_v42 = vld [vmem:[%s2953_s1 + $0x298] sm:$0xff]  ;;  %v2371_v46 = vld [vmem:[%s2953_s1 + $0x290] sm:$0xff]  ;;  %v2413_v19 = vld [vmem:[%s2953_s1 + $0x3e0] sm:$0xff] }
  0x30   : > { %1450 = vmatpush.bf16.msrb.mxu3 %v2352_v43  ;;  %v2380_v43 = vld [vmem:[%s2953_s1 + $0x2d8] sm:$0xff]  ;;  %v2379_v47 = vld [vmem:[%s2953_s1 + $0x2d0] sm:$0xff] }
  0x31   : > { %1409 = vmatpush.bf16.msrb.mxu0 %v2327_v48  ;;  %v2354_v48 = vld [vmem:[%s2953_s1 + $0x208] sm:$0xff]  ;;  %v2388_v20 = vld [vmem:[%s2953_s1 + $0x318] sm:$0xff] }
  0x32   : > { %1423 = vmatpush.bf16.msrb.mxu1 %v2335_v49  ;;  %v2362_v49 = vld [vmem:[%s2953_s1 + $0x248] sm:$0xff]  ;;  %v2396_v21 = vld [vmem:[%s2953_s1 + $0x358] sm:$0xff] }
  0x33   : > { %1437 = vmatpush.bf16.msrb.mxu2 %v2343_v50  ;;  %v2370_v50 = vld [vmem:[%s2953_s1 + $0x288] sm:$0xff] }
  0x34   : > { %1451 = vmatpush.bf16.msrb.mxu3 %v2351_v51  ;;  %v2378_v51 = vld [vmem:[%s2953_s1 + $0x2c8] sm:$0xff] }
  0x35   : > { %1410 = vmatpush.bf16.msrb.mxu0 %v2326_v52  ;;  %v2353_v52 = vld [vmem:[%s2953_s1 + $0x200] sm:$0xff] }
  0x36   : > { %1424 = vmatpush.bf16.msrb.mxu1 %v2334_v53  ;;  %v2361_v53 = vld [vmem:[%s2953_s1 + $0x240] sm:$0xff] }
  0x37   : > { %1438 = vmatpush.bf16.msrb.mxu2 %v2342_v54  ;;  %v2369_v54 = vld [vmem:[%s2953_s1 + $0x280] sm:$0xff] }
  0x38   : > { %1452 = vmatpush.bf16.msrb.mxu3 %v2350_v55  ;;  %v2377_v55 = vld [vmem:[%s2953_s1 + $0x2c0] sm:$0xff] }
  0x39   : > { %1411 = vmatpush.bf16.msrb.mxu0 %v2325_v56  ;;  %v2392_v56 = vld [vmem:[%s2953_s1 + $0x338] sm:$0xff] }
  0x3a   : > { %1425 = vmatpush.bf16.msrb.mxu1 %v2333_v57  ;;  %v2400_v57 = vld [vmem:[%s2953_s1 + $0x378] sm:$0xff] }
  0x3b   : > { %1439 = vmatpush.bf16.msrb.mxu2 %v2341_v58  ;;  %v1728_v58 = vld [vmem:[%s2602_s29 + $0x20] sm:$0xf] }
  0x3c   : > { %1453 = vmatpush.bf16.msrb.mxu3 %v2349_v59  ;;  %v2285_v59 = vld [vmem:[%s2602_s29 + $0x5c] sm:$0xf0] }
  0x3d   : > { %1412 = vmatpush.bf16.msrb.mxu0 %v2324_v60  ;;  %v1736_v60 = vld [vmem:[%s2602_s29 + $0x28] sm:$0xf] }
  0x3e   : > { %1426 = vmatpush.bf16.msrb.mxu1 %v2332_v61  ;;  %v2286_v61 = vld [vmem:[%s2602_s29 + $0x64] sm:$0xf0] }
  0x3f   : > { %1440 = vmatpush.bf16.msrb.mxu2 %v2340_v62  ;;  %v2277_v62 = vld [vmem:[%s2602_s29 + $0x24] sm:$0xf] }
  0x40   : > { %1454 = vmatpush.bf16.msrb.mxu3 %v2348_v63  ;;  %v1730_v63 = vld [vmem:[%s2602_s29 + $0x60] sm:$0xf0] }
  0x41   : > { %1413 = vmatpush.bf16.msrb.mxu0 %v2323_v0  ;;  %v2278_v0 = vld [vmem:[%s2602_s29 + $0x2c] sm:$0xf] }
  0x42   : > { %1427 = vmatpush.bf16.msrb.mxu1 %v2331_v1  ;;  %v1738_v1 = vld [vmem:[%s2602_s29 + $0x68] sm:$0xf0] }
  0x43   : > { %1441 = vmatpush.bf16.msrb.mxu2 %v2339_v2  ;;  %v2408_v2 = vld [vmem:[%s2953_s1 + $0x3b8] sm:$0xff] }
  0x44   : > { %1455 = vmatpush.bf16.msrb.mxu3 %v2347_v3  ;;  %v2416_v3 = vld [vmem:[%s2953_s1 + $0x3f8] sm:$0xff] }
  0x45   : > { %1414 = vmatpush.bf16.msrb.mxu0 %v2322_v4  ;;  %v1729_v4 = vor.u32 %v2285_v59, %v1728_v58 }
  0x46   : > { %1428 = vmatpush.bf16.msrb.mxu1 %v2330_v5  ;;  %v1737_v5 = vor.u32 %v2286_v61, %v1736_v60 }
  0x47   : > { %1442 = vmatpush.bf16.msrb.mxu2 %v2338_v6  ;;  %v1733_v6 = vor.u32 %v2277_v62, %v1730_v63 }
  0x48   : > { %1456 = vmatpush.bf16.msrb.mxu3 %v2346_v7  ;;  %v1741_v7 = vor.u32 %v2278_v0, %v1738_v1 }
  0x49   : > { %1415 = vmatpush.bf16.msrb.mxu0 %v2321_v8  ;;  %v2391_v8 = vld [vmem:[%s2953_s1 + $0x330] sm:$0xff] }
  0x4a   : > { %1429 = vmatpush.bf16.msrb.mxu1 %v2329_v9  ;;  %v2399_v9 = vld [vmem:[%s2953_s1 + $0x370] sm:$0xff] }
  0x4b   : > { %1443 = vmatpush.bf16.msrb.mxu2 %v2337_v10  ;;  %v2407_v10 = vld [vmem:[%s2953_s1 + $0x3b0] sm:$0xff] }
  0x4c   : > { %1457 = vmatpush.bf16.msrb.mxu3 %v2345_v11  ;;  %1416 = vmatmul.bf16.vlgmr.msrb.gmra.mxu0 %v1713_v24  ;;  %v2415_v11 = vld [vmem:[%s2953_s1 + $0x3f0] sm:$0xff] }
  0x4d   : > { %1464 = vmatpush.bf16.msra.mxu0 %v2360_v12  ;;  %1430 = vmatmul.bf16.vlgmr.msrb.gmra.mxu1 %v1717_v26  ;;  %v2390_v12 = vld [vmem:[%s2953_s1 + $0x328] sm:$0xff]  ;;  %v2387_v24 = vld [vmem:[%s2953_s1 + $0x310] sm:$0xff] }
  0x4e   : > { %1478 = vmatpush.bf16.msra.mxu1 %v2368_v13  ;;  %1444 = vmatmul.bf16.vlgmr.msrb.gmra.mxu2 %v1721_v25  ;;  %v2398_v13 = vld [vmem:[%s2953_s1 + $0x368] sm:$0xff]  ;;  %v2395_v25 = vld [vmem:[%s2953_s1 + $0x350] sm:$0xff] }
  0x4f   : > { %1492 = vmatpush.bf16.msra.mxu2 %v2376_v22  ;;  %1458 = vmatmul.bf16.vlgmr.msrb.gmra.mxu3 %v1725_v27  ;;  %v2404_v22 = vld [vmem:[%s2953_s1 + $0x398] sm:$0xff]  ;;  %v2403_v26 = vld [vmem:[%s2953_s1 + $0x390] sm:$0xff] }
  0x50   : > { %1506 = vmatpush.bf16.msra.mxu3 %v2384_v23  ;;  %v2412_v23 = vld [vmem:[%s2953_s1 + $0x3d8] sm:$0xff]  ;;  %v2411_v27 = vld [vmem:[%s2953_s1 + $0x3d0] sm:$0xff] }
  0x51   : > { %1465 = vmatpush.bf16.msra.mxu0 %v2359_v28  ;;  %v2386_v28 = vld [vmem:[%s2953_s1 + $0x308] sm:$0xff] }
  0x52   : > { %1479 = vmatpush.bf16.msra.mxu1 %v2367_v29  ;;  %v2394_v29 = vld [vmem:[%s2953_s1 + $0x348] sm:$0xff] }
  0x53   : > { %1493 = vmatpush.bf16.msra.mxu2 %v2375_v30  ;;  %v2402_v30 = vld [vmem:[%s2953_s1 + $0x388] sm:$0xff] }
  0x54   : > { %1507 = vmatpush.bf16.msra.mxu3 %v2383_v31  ;;  %v2410_v31 = vld [vmem:[%s2953_s1 + $0x3c8] sm:$0xff] }
  0x55   : > { %1466 = vmatpush.bf16.msra.mxu0 %v2358_v32  ;;  %v2385_v32 = vld [vmem:[%s2953_s1 + $0x300] sm:$0xff] }
  0x56   : > { %1480 = vmatpush.bf16.msra.mxu1 %v2366_v33  ;;  %v2393_v33 = vld [vmem:[%s2953_s1 + $0x340] sm:$0xff] }
  0x57   : > { %1494 = vmatpush.bf16.msra.mxu2 %v2374_v34  ;;  %v2401_v34 = vld [vmem:[%s2953_s1 + $0x380] sm:$0xff] }
  0x58   : > { %1508 = vmatpush.bf16.msra.mxu3 %v2382_v35  ;;  %v2409_v35 = vld [vmem:[%s2953_s1 + $0x3c0] sm:$0xff] }
  0x59   : > { %1467 = vmatpush.bf16.msra.mxu0 %v2357_v36  ;;  %v1744_v36 = vld [vmem:[%s2602_s29 + $0x30] sm:$0xf] }
  0x5a   : > { %1481 = vmatpush.bf16.msra.mxu1 %v2365_v37  ;;  %v2287_v37 = vld [vmem:[%s2602_s29 + $0x6c] sm:$0xf0] }
  0x5b   : > { %1495 = vmatpush.bf16.msra.mxu2 %v2373_v38  ;;  %v2279_v38 = vld [vmem:[%s2602_s29 + $0x34] sm:$0xf] }
  0x5c   : > { %1509 = vmatpush.bf16.msra.mxu3 %v2381_v39  ;;  %v1746_v39 = vld [vmem:[%s2602_s29 + $0x70] sm:$0xf0] }
  0x5d   : > { %1468 = vmatpush.bf16.msra.mxu0 %v2356_v40  ;;  %v1752_v40 = vld [vmem:[%s2602_s29 + $0x38] sm:$0xf] }
  0x5e   : > { %1482 = vmatpush.bf16.msra.mxu1 %v2364_v41  ;;  %v2288_v41 = vld [vmem:[%s2602_s29 + $0x74] sm:$0xf0] }
  0x5f   : > { %1496 = vmatpush.bf16.msra.mxu2 %v2372_v42  ;;  %v2280_v42 = vld [vmem:[%s2602_s29 + $0x3c] sm:$0xf] }
  0x60   : > { %1510 = vmatpush.bf16.msra.mxu3 %v2380_v43  ;;  %v1754_v43 = vld [vmem:[%s2602_s29 + $0x78] sm:$0xf0] }
  0x61   : > { %1469 = vmatpush.bf16.msra.mxu0 %v2355_v44  ;;  %v1745_v44 = vor.u32 %v2287_v37, %v1744_v36 }
  0x62   : > { %1483 = vmatpush.bf16.msra.mxu1 %v2363_v45  ;;  %v1749_v45 = vor.u32 %v2279_v38, %v1746_v39 }
  0x63   : > { %1497 = vmatpush.bf16.msra.mxu2 %v2371_v46  ;;  %v1753_v46 = vor.u32 %v2288_v41, %v1752_v40 }
  0x64   : > { %1511 = vmatpush.bf16.msra.mxu3 %v2379_v47  ;;  %v1757_v47 = vor.u32 %v2280_v42, %v1754_v43 }
  0x65   : > { %1470 = vmatpush.bf16.msra.mxu0 %v2354_v48 }
  0x66   : > { %1484 = vmatpush.bf16.msra.mxu1 %v2362_v49 }
  0x67   : > { %1498 = vmatpush.bf16.msra.mxu2 %v2370_v50 }
  0x68   : > { %1512 = vmatpush.bf16.msra.mxu3 %v2378_v51 }
  0x69   : > { %1471 = vmatpush.bf16.msra.mxu0 %v2353_v52 }
  0x6a   : > { %1485 = vmatpush.bf16.msra.mxu1 %v2361_v53 }
  0x6b   : > { %1499 = vmatpush.bf16.msra.mxu2 %v2369_v54 }
  0x6c   : > { %1513 = vmatpush.bf16.msra.mxu3 %v2377_v55  ;;  %1472 = vmatmul.bf16.vlgmr.msra.gmra.mxu0 %v1729_v4 }
  0x6d   : > { %1520 = vmatpush.bf16.msrb.mxu0 %v2392_v56  ;;  %1486 = vmatmul.bf16.vlgmr.msra.gmra.mxu1 %v1733_v6  ;;  %v2446_v56 = vld [vmem:[%s2954_s2] ss:$0 sm:$0xff] }
  0x6e   : > { %1534 = vmatpush.bf16.msrb.mxu1 %v2400_v57  ;;  %1500 = vmatmul.bf16.vlgmr.msra.gmra.mxu2 %v1737_v5 }
  0x6f   : > { %1548 = vmatpush.bf16.msrb.mxu2 %v2408_v2  ;;  %1514 = vmatmul.bf16.vlgmr.msra.gmra.mxu3 %v1741_v7 }
  0x70   : > { %1562 = vmatpush.bf16.msrb.mxu3 %v2416_v3 }
  0x71   : > { %1521 = vmatpush.bf16.msrb.mxu0 %v2391_v8 }
  0x72   : > { %1535 = vmatpush.bf16.msrb.mxu1 %v2399_v9 }
  0x73   : > { %1549 = vmatpush.bf16.msrb.mxu2 %v2407_v10 }
  0x74   : > { %1563 = vmatpush.bf16.msrb.mxu3 %v2415_v11 }
  0x75   : > { %1522 = vmatpush.bf16.msrb.mxu0 %v2390_v12 }
  0x76   : > { %1536 = vmatpush.bf16.msrb.mxu1 %v2398_v13 }
  0x77   : > { %1550 = vmatpush.bf16.msrb.mxu2 %v2406_v14 }
  0x78   : > { %1564 = vmatpush.bf16.msrb.mxu3 %v2414_v15 }
  0x79   : > { %1523 = vmatpush.bf16.msrb.mxu0 %v2389_v16 }
  0x7a   : > { %1537 = vmatpush.bf16.msrb.mxu1 %v2397_v17 }
  0x7b   : > { %1551 = vmatpush.bf16.msrb.mxu2 %v2405_v18 }
  0x7c   : > { %1565 = vmatpush.bf16.msrb.mxu3 %v2413_v19 }
  0x7d   : > { %1524 = vmatpush.bf16.msrb.mxu0 %v2388_v20 }
  0x7e   : > { %1538 = vmatpush.bf16.msrb.mxu1 %v2396_v21 }
  0x7f   : > { %1552 = vmatpush.bf16.msrb.mxu2 %v2404_v22 }
  0x80   : > { %1566 = vmatpush.bf16.msrb.mxu3 %v2412_v23 }
  0x81   : > { %1525 = vmatpush.bf16.msrb.mxu0 %v2387_v24 }
  0x82   : > { %1539 = vmatpush.bf16.msrb.mxu1 %v2395_v25 }
  0x83   : > { %1553 = vmatpush.bf16.msrb.mxu2 %v2403_v26 }
  0x84   : > { %1567 = vmatpush.bf16.msrb.mxu3 %v2411_v27 }
  0x85   : > { %1526 = vmatpush.bf16.msrb.mxu0 %v2386_v28 }
  0x86   : > { %1540 = vmatpush.bf16.msrb.mxu1 %v2394_v29 }
  0x87   : > { %1554 = vmatpush.bf16.msrb.mxu2 %v2402_v30 }
  0x88   : > { %1568 = vmatpush.bf16.msrb.mxu3 %v2410_v31 }
  0x89   : > { %1527 = vmatpush.bf16.msrb.mxu0 %v2385_v32 }
  0x8a   : > { %1541 = vmatpush.bf16.msrb.mxu1 %v2393_v33 }
  0x8b   : > { %1555 = vmatpush.bf16.msrb.mxu2 %v2401_v34 }
  0x8c   : > { %1569 = vmatpush.bf16.msrb.mxu3 %v2409_v35  ;;  %1528 = vmatmul.bf16.vlgmr.msrb.gmra.mxu0 %v1745_v44 }
  0x8d   : > { %1542 = vmatmul.bf16.vlgmr.msrb.gmra.mxu1 %v1749_v45 }
  0x8e   : > { %1556 = vmatmul.bf16.vlgmr.msrb.gmra.mxu2 %v1753_v46 }
  0x8f   : > { %1570 = vmatmul.bf16.vlgmr.msrb.gmra.mxu3 %v1757_v47 }
  0xa9   : > { %v1361_v48 = vpop.f32.mrf.mxu0 }
  0xaa   : > { %v1375_v49 = vpop.f32.mrf.mxu1  ;;  %v1362_v58 = vadd.f32 %v2446_v56, %v1361_v48 }
  0xac   : > { %v1376_v60 = vadd.f32 %v1375_v49, %v1362_v58 }
  0xb1   : > { %v1389_v50 = vpop.f32.mrf.mxu2  ;;  %v1363_v52 = vpop.f32.mrf.mxu0 }
  0xb2   : > { %v1403_v51 = vpop.f32.mrf.mxu3  ;;  %v1377_v53 = vpop.f32.mrf.mxu1  ;;  %v1364_v61 = vadd.f32 %v2446_v56, %v1363_v52  ;;  %v1390_v0 = vadd.f32 %v1389_v50, %v1376_v60 }
  0xb4   : > { %v1378_v1 = vadd.f32 %v1377_v53, %v1364_v61  ;;  %v1404_v4 = vadd.f32 %v1403_v51, %v1390_v0 }
  0xb9   : > { %v1391_v54 = vpop.f32.mrf.mxu2 }
  0xba   : > { %v1405_v55 = vpop.f32.mrf.mxu3  ;;  %v1392_v5 = vadd.f32 %v1391_v54, %v1378_v1 }
  0xbc   : > { %v1406_v8 = vadd.f32 %v1405_v55, %v1392_v5 }
  0xc9   : > { %v1417_v57 = vpop.f32.mrf.mxu0 }
  0xca   : > { %v1431_v59 = vpop.f32.mrf.mxu1  ;;  %v1418_v9 = vadd.f32 %v1417_v57, %v1404_v4 }
  0xcc   : > { %v1432_v12 = vadd.f32 %v1431_v59, %v1418_v9 }
  0xd1   : > { %v1445_v62 = vpop.f32.mrf.mxu2  ;;  %v1419_v2 = vpop.f32.mrf.mxu0 }
  0xd2   : > { %v1459_v63 = vpop.f32.mrf.mxu3  ;;  %v1433_v3 = vpop.f32.mrf.mxu1  ;;  %v1420_v13 = vadd.f32 %v1419_v2, %v1406_v8  ;;  %v1446_v16 = vadd.f32 %v1445_v62, %v1432_v12 }
  0xd4   : > { %v1434_v17 = vadd.f32 %v1433_v3, %v1420_v13  ;;  %v1460_v20 = vadd.f32 %v1459_v63, %v1446_v16 }
  0xd9   : > { %v1447_v6 = vpop.f32.mrf.mxu2 }
  0xda   : > { %v1461_v7 = vpop.f32.mrf.mxu3  ;;  %v1448_v18 = vadd.f32 %v1447_v6, %v1434_v17 }
  0xdc   : > { %v1462_v22 = vadd.f32 %v1461_v7, %v1448_v18 }
  0xe9   : > { %v1473_v10 = vpop.f32.mrf.mxu0 }
  0xea   : > { %v1487_v11 = vpop.f32.mrf.mxu1  ;;  %v1474_v23 = vadd.f32 %v1473_v10, %v1460_v20 }
  0xec   : > { %v1488_v27 = vadd.f32 %v1487_v11, %v1474_v23 }
  0xf1   : > { %v1501_v14 = vpop.f32.mrf.mxu2  ;;  %v1475_v19 = vpop.f32.mrf.mxu0 }
  0xf2   : > { %v1515_v15 = vpop.f32.mrf.mxu3  ;;  %v1489_v21 = vpop.f32.mrf.mxu1  ;;  %v1476_v24 = vadd.f32 %v1475_v19, %v1462_v22  ;;  %v1502_v29 = vadd.f32 %v1501_v14, %v1488_v27 }
  0xf4   : > { %v1490_v30 = vadd.f32 %v1489_v21, %v1476_v24  ;;  %v1516_v33 = vadd.f32 %v1515_v15, %v1502_v29 }
  0xf9   : > { %v1503_v25 = vpop.f32.mrf.mxu2 }
  0xfa   : > { %v1517_v26 = vpop.f32.mrf.mxu3  ;;  %v1504_v32 = vadd.f32 %v1503_v25, %v1490_v30 }
  0xfc   : > { %v1518_v36 = vadd.f32 %v1517_v26, %v1504_v32 }
 0x109   : > { %v1529_v28 = vpop.f32.mrf.mxu0 }
 0x10a   : > { %v1543_v31 = vpop.f32.mrf.mxu1  ;;  %v1530_v37 = vadd.f32 %v1529_v28, %v1516_v33 }
 0x10c   : > { %v1544_v40 = vadd.f32 %v1543_v31, %v1530_v37 }
 0x111   : > { %v1557_v34 = vpop.f32.mrf.mxu2  ;;  %v1531_v38 = vpop.f32.mrf.mxu0 }
 0x112   : > { %v1571_v35 = vpop.f32.mrf.mxu3  ;;  %v1532_v39 = vadd.f32 %v1531_v38, %v1518_v36  ;;  %v1545_v41 = vpop.f32.mrf.mxu1  ;;  %v1558_v42 = vadd.f32 %v1557_v34, %v1544_v40 }
 0x114   : > { %v1546_v43 = vadd.f32 %v1545_v41, %v1532_v39  ;;  %v1572_v47 = vadd.f32 %v1571_v35, %v1558_v42 }
 0x119   : > { %v1559_v44 = vpop.f32.mrf.mxu2 }
 0x11a   : > { %v1560_v45 = vadd.f32 %v1559_v44, %v1546_v43  ;;  %v1573_v46 = vpop.f32.mrf.mxu3 }
 0x11c   : > { %v1574_v48 = vadd.f32 %v1573_v46, %v1560_v45 }
 0x11e   : > { %v2420_v49 = vpack.c.bf16 %v1574_v48, %v1572_v47 }
 0x120   : > { %2421 = vst [vmem:[%s226_s9] sm:$0xff] %v2420_v49  }
 0x121 PF: > { %s13_s14 = sadd.s32 1, %s2469_s14   ;;  %s2956_s12 = smov %s2465_s13 }
 0x122   : > { %p10_p5 = scmp.ge.s32.totalorder %s13_s14, 10   ;;  %s2957_s13 = smov %s2959_s15 }
 0x124   :  { %12 = sbr.rel (!%p10_p5) target bundleno = 2 (0x2), region = 68 }

</bundles_post_ra>
